<compile_context>
chip_gen: v7x
topology: tpu7x:2x2x1
jax: 0.10.0
libtpu: 0.0.40
codegen_flags: <defaults>
</compile_context>

<pallas_src>
import functools

import jax
import jax.numpy as jnp
from jax.experimental import pallas as pl
from jax.experimental.pallas import tpu as pltpu


def _adain_kernel(content_ref, style_ref, out_ref, *, eps, style_strength, n):
    """One block = (TR, h*w): TR full (batch, channel) rows."""
    c = content_ref[...].astype(jnp.float32)
    s = style_ref[...].astype(jnp.float32)

    inv_n = 1.0 / n
    inv_nm1 = 1.0 / max(n - 1, 1)  # torch.std_mean default is unbiased (ddof=1)

    # Per-row (per (b, c) instance) statistics along the lane axis (XLU reductions).
    c_mean = jnp.sum(c, axis=-1, keepdims=True) * inv_n
    c_ctr = c - c_mean
    c_std = jnp.sqrt(jnp.sum(c_ctr * c_ctr, axis=-1, keepdims=True) * inv_nm1)

    s_mean = jnp.sum(s, axis=-1, keepdims=True) * inv_n
    s_ctr = s - s_mean
    s_std = jnp.sqrt(jnp.sum(s_ctr * s_ctr, axis=-1, keepdims=True) * inv_nm1)

    stylized = (c_ctr / (c_std + eps)) * s_std + s_mean
    out = (1.0 - style_strength) * c + style_strength * stylized
    out_ref[...] = out.astype(out_ref.dtype)


def _pick_row_tile(rows, hw, itemsize, target_bytes=2 * 1024 * 1024):
    """Largest row-tile that divides `rows`, is a multiple of 8 (or the full
    extent), and keeps one input tile around `target_bytes`."""
    if rows % 8 != 0:
        return rows  # full-extent block is always legal
    cap = max(8, ((target_bytes // max(1, hw * itemsize)) // 8) * 8)
    tr = min(rows, cap)
    while rows % tr != 0:
        tr -= 8
    return tr


def adain_forward(content, style, style_strength=1.0, eps=1e-5):
    """JAX wrapper replicating AdaIN.forward."""
    assert content.shape == style.shape, "content/style must share a shape"
    b, c, h, w = content.shape
    hw = h * w
    rows = b * c

    # Lane-dense slabs: one row per (batch, channel) instance.
    content_flat = content.reshape(rows, hw)
    style_flat = style.reshape(rows, hw)

    tr = _pick_row_tile(rows, hw, content_flat.dtype.itemsize)
    grid = (rows // tr,)
    block = pl.BlockSpec((tr, hw), lambda i: (i, 0))

    itemsize = content_flat.dtype.itemsize
    cost = pl.CostEstimate(
        flops=10 * rows * hw,            # center, square, normalize, affine, blend
        transcendentals=2 * rows,        # two sqrt per (b, c) row
        bytes_accessed=3 * rows * hw * itemsize,  # 2 inputs + 1 output
    )

    out = pl.pallas_call(
        functools.partial(
            _adain_kernel, eps=float(eps), style_strength=float(style_strength), n=hw
        ),
        out_shape=jax.ShapeDtypeStruct((rows, hw), content.dtype),
        grid=grid,
        in_specs=[block, block],
        out_specs=block,
        compiler_params=pltpu.CompilerParams(
            dimension_semantics=("parallel",),      # shard rows across v7x's 2 TCs
            vmem_limit_bytes=32 * 1024 * 1024,      # explicit, fits v7x scoped VMEM
        ),
        cost_estimate=cost,
    )(content_flat, style_flat)

    return out.reshape(b, c, h, w)


def _adain_ref(content, style, style_strength=1.0, eps=1e-5):
    """Pure-JAX reference mirroring the PyTorch module (unbiased std)."""
    b, c, h, w = content.shape
    cf = content.reshape(b, c, -1)
    sf = style.reshape(b, c, -1)
    c_mean = jnp.mean(cf, axis=2, keepdims=True)
    c_std = jnp.std(cf, axis=2, keepdims=True, ddof=1)
    s_mean = jnp.mean(sf, axis=2, keepdims=True)
    s_std = jnp.std(sf, axis=2, keepdims=True, ddof=1)
    normalized = (cf - c_mean) / (c_std + eps)
    stylized = (normalized * s_std + s_mean).reshape(b, c, h, w)
    return (1.0 - style_strength) * content + style_strength * stylized


if __name__ == "__main__":
    key = jax.random.PRNGKey(0)
    k_content, k_style = jax.random.split(key)
    # NCHW inputs consistent with the conv-net context of the original module.
    content = jax.random.normal(k_content, (2, 4, 16, 16), dtype=jnp.float32)
    style = jax.random.normal(k_style, (2, 4, 16, 16), dtype=jnp.float32) * 2.0 + 0.5

    y = jax.block_until_ready(adain_forward(content, style, style_strength=1.0))
    assert y.shape == content.shape and y.dtype == content.dtype

    y_ref = _adain_ref(content, style, style_strength=1.0)
    err = float(jnp.max(jnp.abs(y - y_ref)))
    assert err < 1e-4, f"full-strength AdaIN mismatch: max abs err {err}"

    # Partial style strength path.
    y_half = jax.block_until_ready(adain_forward(content, style, style_strength=0.5))
    y_half_ref = _adain_ref(content, style, style_strength=0.5)
    err_half = float(jnp.max(jnp.abs(y_half - y_half_ref)))
    assert err_half < 1e-4, f"half-strength AdaIN mismatch: max abs err {err_half}"

    print("KERNEL_OK")
</pallas_src>

<mosaic_0001>
module attributes {stable_mosaic.version = 11 : i64} {
  func.func @_adain_kernel(%arg0: i32, %arg1: memref<8x256xf32, #tpu.memory_space<vmem>>, %arg2: memref<8x256xf32, #tpu.memory_space<vmem>>, %arg3: memref<8x256xf32, #tpu.memory_space<vmem>>) attributes {dimension_semantics = [#tpu.dimension_semantics<parallel>], iteration_bounds = array<i64: 1>, scalar_prefetch = 0 : i64, scratch_operands = 0 : i64, tpu.core_type = #tpu.core_type<tc>, window_params = [{transform_indices = @transform_0, window_bounds = array<i64: 8, 256>}, {transform_indices = @transform_1, window_bounds = array<i64: 8, 256>}, {transform_indices = @transform_2, window_bounds = array<i64: 8, 256>}]} {
    %c0 = arith.constant 0 : index
    %c0_0 = arith.constant 0 : index
    %0 = vector.load %arg1[%c0, %c0_0] : memref<8x256xf32, #tpu.memory_space<vmem>>, vector<8x256xf32>
    %c0_1 = arith.constant 0 : index
    %c0_2 = arith.constant 0 : index
    %1 = vector.load %arg2[%c0_1, %c0_2] : memref<8x256xf32, #tpu.memory_space<vmem>>, vector<8x256xf32>
    %cst = arith.constant dense<0.000000e+00> : vector<8xf32>
    %2 = vector.multi_reduction <add>, %0, %cst [1] : vector<8x256xf32> to vector<8xf32>
    %3 = vector.shape_cast %2 : vector<8xf32> to vector<8x1xf32>
    %cst_3 = arith.constant 3.906250e-03 : f32
    %4 = vector.broadcast %cst_3 : f32 to vector<8x1xf32>
    %5 = arith.mulf %3, %4 : vector<8x1xf32>
    %6 = vector.broadcast %5 : vector<8x1xf32> to vector<8x256xf32>
    %7 = arith.subf %0, %6 : vector<8x256xf32>
    %8 = arith.mulf %7, %7 : vector<8x256xf32>
    %cst_4 = arith.constant dense<0.000000e+00> : vector<8xf32>
    %9 = vector.multi_reduction <add>, %8, %cst_4 [1] : vector<8x256xf32> to vector<8xf32>
    %10 = vector.shape_cast %9 : vector<8xf32> to vector<8x1xf32>
    %cst_5 = arith.constant 0.00392156886 : f32
    %11 = vector.broadcast %cst_5 : f32 to vector<8x1xf32>
    %12 = arith.mulf %10, %11 : vector<8x1xf32>
    %13 = math.sqrt %12 : vector<8x1xf32>
    %cst_6 = arith.constant dense<0.000000e+00> : vector<8xf32>
    %14 = vector.multi_reduction <add>, %1, %cst_6 [1] : vector<8x256xf32> to vector<8xf32>
    %15 = vector.shape_cast %14 : vector<8xf32> to vector<8x1xf32>
    %cst_7 = arith.constant 3.906250e-03 : f32
    %16 = vector.broadcast %cst_7 : f32 to vector<8x1xf32>
    %17 = arith.mulf %15, %16 : vector<8x1xf32>
    %18 = vector.broadcast %17 : vector<8x1xf32> to vector<8x256xf32>
    %19 = arith.subf %1, %18 : vector<8x256xf32>
    %20 = arith.mulf %19, %19 : vector<8x256xf32>
    %cst_8 = arith.constant dense<0.000000e+00> : vector<8xf32>
    %21 = vector.multi_reduction <add>, %20, %cst_8 [1] : vector<8x256xf32> to vector<8xf32>
    %22 = vector.shape_cast %21 : vector<8xf32> to vector<8x1xf32>
    %cst_9 = arith.constant 0.00392156886 : f32
    %23 = vector.broadcast %cst_9 : f32 to vector<8x1xf32>
    %24 = arith.mulf %22, %23 : vector<8x1xf32>
    %25 = math.sqrt %24 : vector<8x1xf32>
    %cst_10 = arith.constant 9.99999974E-6 : f32
    %26 = vector.broadcast %cst_10 : f32 to vector<8x1xf32>
    %27 = arith.addf %13, %26 : vector<8x1xf32>
    %28 = vector.broadcast %27 : vector<8x1xf32> to vector<8x256xf32>
    %29 = arith.divf %7, %28 : vector<8x256xf32>
    %30 = vector.broadcast %25 : vector<8x1xf32> to vector<8x256xf32>
    %31 = arith.mulf %29, %30 : vector<8x256xf32>
    %32 = vector.broadcast %17 : vector<8x1xf32> to vector<8x256xf32>
    %33 = arith.addf %31, %32 : vector<8x256xf32>
    %cst_11 = arith.constant 0.000000e+00 : f32
    %34 = vector.broadcast %cst_11 : f32 to vector<8x256xf32>
    %35 = arith.mulf %34, %0 : vector<8x256xf32>
    %cst_12 = arith.constant 1.000000e+00 : f32
    %36 = vector.broadcast %cst_12 : f32 to vector<8x256xf32>
    %37 = arith.mulf %36, %33 : vector<8x256xf32>
    %38 = arith.addf %35, %37 : vector<8x256xf32>
    %c0_13 = arith.constant 0 : index
    %c0_14 = arith.constant 0 : index
    %39 = vector.load %arg3[%c0_13, %c0_14] : memref<8x256xf32, #tpu.memory_space<vmem>>, vector<8x256xf32>
    tpu.vector_store %arg3[%c0_13, %c0_14], %38 {strides = array<i32>} : memref<8x256xf32, #tpu.memory_space<vmem>>, vector<8x256xf32>,
    return
  }
  func.func @transform_0(%arg0: i32) -> (i32, i32) {
    %c0_i32 = arith.constant 0 : i32
    %c0_i32_0 = arith.constant 0 : i32
    return %arg0, %c0_i32 : i32, i32
  }
  func.func @transform_1(%arg0: i32) -> (i32, i32) {
    %c0_i32 = arith.constant 0 : i32
    %c0_i32_0 = arith.constant 0 : i32
    return %arg0, %c0_i32 : i32, i32
  }
  func.func @transform_2(%arg0: i32) -> (i32, i32) {
    %c0_i32 = arith.constant 0 : i32
    %c0_i32_0 = arith.constant 0 : i32
    return %arg0, %c0_i32 : i32, i32
  }
}

</mosaic_0001>

<bundles_post_ra>
// kernel: tpu_custom_call.1
= control target key start
LH: loop header
LB: loop body
LE: loop exit
PB: predicated region body
PF: predicated region fallthrough
CT: control target
= control target key end

     0   :  { %7 = vsyncpa [#allocation3], 0  ;;  %s243_s0 = inlined_call_operand.hbm [shape: f32[8,256], index: 0, kind: input, shape index: {}]   ;;  %s244_s1 = inlined_call_operand.hbm [shape: f32[8,256], index: 1, kind: input, shape index: {}]   ;;  %s245_s2 = inlined_call_operand.hbm [shape: f32[8,256], index: 2, kind: output, shape index: {}]  }
   0x1   :  { %8 = vsyncpa [#allocation6], 0 }
   0x2   :  { %9 = vsyncpa [#allocation4], 0  ;;  %s189_s9 = smov [#allocation2]   ;;  %s190_s11 = smov [#allocation5]  }
   0x3   :  { %s16_s10 = sshll.u32 %s189_s9, 4  ;;  %s26_s12 = sshll.u32 %s190_s11, 4  ;;  %s17_s10 = int_to_ptr.vmem [resolvable:$true] %s16_s10  ;;  %s27_s12 = int_to_ptr.vmem [resolvable:$true] %s26_s12 }
   0x4   :  { %s117_s15 = scalar_lea.hbm %s243_s0, 256 }
   0x5   :  { %p118_p0 = scmp.ne.s32.totalorder %s243_s0, %s117_s15  ;;  %p121_p1 = scmp.lt.u32.totalorder %s117_s15, %s243_s0 }
   0x7   :  { %p123_p2 = pnand %p121_p1, %p118_p0 }
   0x9   :  { %126 = shalt.err (!%p123_p2)
}
   0xa   :  { %s127_s20 = scalar_lea.vmem %s17_s10, 256  ;;  %p132_p4 = scmp.lt.s32.totalorder %s17_s10, %s17_s10 }
   0xb   :  { %p128_p3 = scmp.ne.s32.totalorder %s17_s10, %s127_s20  ;;  %p133_p5 = scmp.lt.s32.totalorder %s127_s20, %s127_s20 }
   0xd   :  { %p134_p6 = por %p133_p5, %p132_p4 }
   0xf   :  { %p135_p7 = pnand %p134_p6, %p128_p3 }
  0x11   :  { %138 = shalt.err (!%p135_p7)
}
  0x12   :  { %19 = dma.hbm_to_vmem [thread:$0]  %s243_s0, 256, %s17_s10, [#allocation3]  }
  0x13   :  { %s139_s25 = scalar_lea.hbm %s244_s1, 256 }
  0x14   :  { %p140_p8 = scmp.ne.s32.totalorder %s244_s1, %s139_s25  ;;  %p143_p9 = scmp.lt.u32.totalorder %s139_s25, %s244_s1 }
  0x16   :  { %p145_p10 = pnand %p143_p9, %p140_p8 }
  0x18   :  { %148 = shalt.err (!%p145_p10)
}
  0x19   :  { %s149_s30 = scalar_lea.vmem %s27_s12, 256  ;;  %p154_p12 = scmp.lt.s32.totalorder %s27_s12, %s27_s12 }
  0x1a   :  { %p150_p11 = scmp.ne.s32.totalorder %s27_s12, %s149_s30  ;;  %p155_p13 = scmp.lt.s32.totalorder %s149_s30, %s149_s30 }
  0x1c   :  { %p156_p0 = por %p155_p13, %p154_p12 }
  0x1e   :  { %p157_p1 = pnand %p156_p0, %p150_p11 }
  0x20   :  { %160 = shalt.err (!%p157_p1)
}
  0x21   :  { %29 = dma.hbm_to_vmem [thread:$0]  %s244_s1, 256, %s27_s12, [#allocation6]  }
  0x22   :  { %183 = dma.done.wait [#allocation3], 256  }
  0x23   :  { %184 = vsyncadd [#allocation3], 4294967040 }
  0x24   :  { %185 = dma.done.wait [#allocation6], 256  }
  0x25   :  { %186 = vsyncadd [#allocation6], 4294967040  ;;  %v36_v0 = vld [vmem:[#allocation2] sm:$0xff]  ;;  %v37_v1 = vld [vmem:[#allocation2 + $0x8] sm:$0xff]  ;;  %s191_s1 = smov [#allocation7]  }
  0x26   :  { %v38_v2 = vld [vmem:[#allocation5] sm:$0xff]  ;;  %v40_v3 = vadd.f32 %v37_v1, %v36_v0  ;;  %v39_v4 = vld [vmem:[#allocation5 + $0x8] sm:$0xff]  ;;  %v86_v38 = vmul.f32 0.0, %v36_v0  ;;  %v87_v39 = vmul.f32 0.0, %v37_v1  ;;  %s98_s4 = sshll.u32 %s191_s1, 4  ;;  %s99_s4 = int_to_ptr.vmem [resolvable:$true] %s98_s4 }
  0x27   :  { %v59_v5 = vadd.f32 %v39_v4, %v38_v2  ;;  %s161_s5 = scalar_lea.vmem %s99_s4, 256  ;;  %p166_p3 = scmp.lt.s32.totalorder %s99_s4, %s99_s4 }
  0x28   :  { %41 = vadd.xlane.f32.xlu0 %v40_v3  ;;  %p162_p2 = scmp.ne.s32.totalorder %s99_s4, %s161_s5  ;;  %p167_p4 = scmp.lt.s32.totalorder %s161_s5, %s161_s5 }
  0x2a   :  { %p168_p5 = por %p167_p4, %p166_p3 }
  0x2c   :  { %60 = vadd.xlane.f32.xlu0 %v59_v5  ;;  %p169_p6 = pnand %p168_p5, %p162_p2 }
  0xb5   :  { %v42_v6 = vpop.xlane.xlu0 %41 }
  0xb6   :  { %v43_v7 = vmul.f32 0.00390625, %v42_v6 }
  0xb8   :  { %v44_v8 = vsub.f32 %v36_v0, %v43_v7  ;;  %v45_v9 = vsub.f32 %v37_v1, %v43_v7 }
  0xb9   :  { %v61_v10 = vpop.xlane.xlu0 %60 }
  0xba   :  { %v62_v11 = vmul.f32 0.00390625, %v61_v10  ;;  %v46_v12 = vmul.f32 %v44_v8, %v44_v8  ;;  %v47_v13 = vmul.f32 %v45_v9, %v45_v9 }
  0xbc   :  { %v48_v14 = vadd.f32 %v47_v13, %v46_v12  ;;  %v63_v15 = vsub.f32 %v38_v2, %v62_v11  ;;  %v64_v16 = vsub.f32 %v39_v4, %v62_v11 }
  0xbe   :  { %49 = vadd.xlane.f32.xlu1 %v48_v14  ;;  %v65_v17 = vmul.f32 %v63_v15, %v63_v15  ;;  %v66_v18 = vmul.f32 %v64_v16, %v64_v16 }
  0xc0   :  { %v67_v19 = vadd.f32 %v66_v18, %v65_v17 }
  0xc2   :  { %68 = vadd.xlane.f32.xlu1 %v67_v19 }
 0x14b   :  { %v50_v20 = vpop.xlane.xlu1 %49 }
 0x14c   :  { %v51_v21 = vmul.f32 0.003921569, %v50_v20 }
 0x14e   :  { %111 = vrsqrt.f32 %v51_v21  ;;  %vm54_vm0 = vcmp.eq.f32.partialorder %v51_v21, inf  ;;  %v57_v26 = vand.u32 2147483648, %v51_v21  ;;  %vm56_vm1 = vcmp.eq.f32.partialorder %v51_v21, 0.0 }
 0x14f   :  { %v69_v22 = vpop.xlane.xlu1 %68 }
 0x150   :  { %v70_v23 = vmul.f32 0.003921569, %v69_v22 }
 0x152   :  { %113 = vrsqrt.f32 %v70_v23  ;;  %vm73_vm2 = vcmp.eq.f32.partialorder %v70_v23, inf  ;;  %v76_v32 = vand.u32 2147483648, %v70_v23  ;;  %vm75_vm3 = vcmp.eq.f32.partialorder %v70_v23, 0.0 }
 0x158   :  { %v112_v24 = vpop.eup %111 }
 0x159   :  { %v53_v25 = vmul.f32 %v112_v24, %v51_v21 }
 0x15b   :  { %v55_v27 = vsel %vm54_vm0, %v51_v21, %v53_v25 }
 0x15c   :  { %v58_v28 = vsel %vm56_vm1, %v57_v26, %v55_v27  ;;  %v114_v30 = vpop.eup %113 }
 0x15d   :  { %v78_v29 = vadd.f32 1e-05, %v58_v28  ;;  %v72_v31 = vmul.f32 %v114_v30, %v70_v23 }
 0x15f   :  { %115 = vrcp.f32 %v78_v29  ;;  %v74_v33 = vsel %vm73_vm2, %v70_v23, %v72_v31 }
 0x160   :  { %v77_v37 = vsel %vm75_vm3, %v76_v32, %v74_v33 }
 0x169   :  { %v116_v34 = vpop.eup %115 }
 0x16a   :  { %v80_v35 = vmul.f32 %v116_v34, %v44_v8  ;;  %v81_v36 = vmul.f32 %v116_v34, %v45_v9 }
 0x16c   :  { %v82_v40 = vmul.f32 %v80_v35, %v77_v37  ;;  %v83_v41 = vmul.f32 %v81_v36, %v77_v37 }
 0x16e   :  { %v84_v42 = vadd.f32 %v82_v40, %v62_v11  ;;  %v85_v43 = vadd.f32 %v83_v41, %v62_v11 }
 0x170   :  { %v88_v44 = vadd.f32 %v86_v38, %v84_v42  ;;  %v89_v45 = vadd.f32 %v87_v39, %v85_v43 }
 0x172   :  { %90 = vst [vmem:[#allocation7] sm:$0xff] %v88_v44  ;;  %91 = vst [vmem:[#allocation7 + $0x8] sm:$0xff] %v89_v45 }
 0x173   :  { %172 = shalt.err (!%p169_p6)
}
 0x174   :  { %s173_s8 = scalar_lea.hbm %s245_s2, 256 }
 0x175   :  { %p174_p7 = scmp.ne.s32.totalorder %s245_s2, %s173_s8  ;;  %p177_p8 = scmp.lt.u32.totalorder %s173_s8, %s245_s2 }
 0x177   :  { %p179_p9 = pnand %p177_p8, %p174_p7 }
 0x179   :  { %182 = shalt.err (!%p179_p9)
}
 0x17a   :  { %101 = dma.vmem_to_hbm [thread:$0]  %s99_s4, 256, %s245_s2, [#allocation4]  }
 0x17b   :  { %187 = dma.done.wait [#allocation4], 256  }
 0x17c   :  { %188 = vsyncadd [#allocation4], 4294967040 }
 0x17d   :  { %105 = vsyncpa [#allocation3], 1 }
 0x17e   :  { %106 = vsyncpa [#allocation6], 1 }
 0x17f   :  { %107 = vsyncpa [#allocation4], 1 }

</bundles_post_ra>
